<compile_context>
chip_gen: v6e
topology: v6e:2x2x1
jax: 0.10.0
libtpu: 0.0.40
codegen_flags: <defaults>
</compile_context>

<pallas_src>
import functools

import jax
import jax.numpy as jnp
from jax.experimental import pallas as pl
from jax.experimental.pallas import tpu as pltpu

HIDDEN = 256


def _actor_kernel(max_action, s_ref, w1_ref, b1_ref, w2_ref, b2_ref,
                  w3_ref, b3_ref, o_ref):
    # 3 bf16 MXU matmuls with f32 accumulation + relu/relu/tanh in f32.
    x = s_ref[...]                                                     # bf16 (tb, sd_pad)
    h = jnp.dot(x, w1_ref[...], preferred_element_type=jnp.float32)
    h = jnp.maximum(h + b1_ref[...], 0.0)                              # relu(l1(s)), f32
    h = jnp.dot(h.astype(jnp.bfloat16), w2_ref[...],
                preferred_element_type=jnp.float32)
    h = jnp.maximum(h + b2_ref[...], 0.0)                              # relu(l2(a)), f32
    h = jnp.dot(h.astype(jnp.bfloat16), w3_ref[...],
                preferred_element_type=jnp.float32)
    h = h + b3_ref[...]
    o_ref[...] = (max_action * jnp.tanh(h)).astype(o_ref.dtype)        # max_action*tanh(l3(a))


def _round_up(x, m):
    return ((x + m - 1) // m) * m


def actor_forward(state, params, max_action, *, block_batch=512):
    """state: [B, state_dim] f32.  params: dict w1,b1,w2,b2,w3,b3 ([in,out] weights).
    Returns [B, action_dim] f32."""
    B, state_dim = state.shape
    hidden = params["w1"].shape[1]
    action_dim = params["w3"].shape[1]

    bf16, f32 = jnp.bfloat16, jnp.float32

    # ---- lane-dense padding of the narrow dims -------------------------------
    sd_pad = max(128, _round_up(state_dim, 128))
    ad_pad = max(128, _round_up(action_dim, 128))

    # ---- batch tiling --------------------------------------------------------
    b8 = max(8, _round_up(B, 8))
    if B <= 64:
        tb = b8                                   # single small tile
    else:
        # >= 2 grid steps so both v7x TensorCores get work, capped at block_batch.
        tb = min(block_batch, _round_up((b8 + 1) // 2, 8))
    b_pad = _round_up(B, tb)
    grid = (b_pad // tb,)

    # ---- operand prep: pad + cast (weights -> bf16, biases -> f32) -----------
    st = jnp.pad(state.astype(f32),
                 ((0, b_pad - B), (0, sd_pad - state_dim))).astype(bf16)
    w1 = jnp.pad(params["w1"].astype(bf16), ((0, sd_pad - state_dim), (0, 0)))
    b1 = params["b1"].astype(f32).reshape(1, hidden)
    w2 = params["w2"].astype(bf16)
    b2 = params["b2"].astype(f32).reshape(1, hidden)
    w3 = jnp.pad(params["w3"].astype(bf16), ((0, 0), (0, ad_pad - action_dim)))
    b3 = jnp.pad(params["b3"].astype(f32).reshape(1, action_dim),
                 ((0, 0), (0, ad_pad - action_dim)))

    def _resident(arr):
        # Constant block index -> stays resident in VMEM across all grid steps.
        return pl.BlockSpec(arr.shape, lambda i: (0, 0))

    in_specs = [
        pl.BlockSpec((tb, sd_pad), lambda i: (i, 0)),   # state: tiled over batch
        _resident(w1), _resident(b1),
        _resident(w2), _resident(b2),
        _resident(w3), _resident(b3),
    ]
    out_spec = pl.BlockSpec((tb, ad_pad), lambda i: (i, 0))

    def _nbytes(a):
        return int(a.size) * a.dtype.itemsize

    weight_bytes = sum(_nbytes(a) for a in (w1, b1, w2, b2, w3, b3))
    flops = 2 * b_pad * (sd_pad * hidden + hidden * hidden + hidden * ad_pad)
    cost = pl.CostEstimate(
        flops=flops,
        transcendentals=b_pad * ad_pad,
        bytes_accessed=weight_bytes + _nbytes(st) + b_pad * ad_pad * 4,
    )

    kernel = functools.partial(_actor_kernel, float(max_action))

    out = pl.pallas_call(
        kernel,
        out_shape=jax.ShapeDtypeStruct((b_pad, ad_pad), jnp.float32),
        grid=grid,
        in_specs=in_specs,
        out_specs=out_spec,
        compiler_params=pltpu.CompilerParams(
            dimension_semantics=("parallel",),
        ),
        cost_estimate=cost,
    )(st, w1, b1, w2, b2, w3, b3)

    # Drop batch padding and the zero-padded action lanes.
    return out[:B, :action_dim]


def init_actor_params(key, state_dim, action_dim, hidden=HIDDEN,
                      weight_dtype=jnp.bfloat16):
    """Init mimicking PyTorch nn.Linear default (U[-1/sqrt(fan_in), +]).
    Weights are stored in bf16 (MXU operand dtype); biases stay f32."""
    ks = jax.random.split(key, 6)

    def lin(kw, kb, fan_in, fan_out):
        bound = 1.0 / jnp.sqrt(jnp.float32(fan_in))
        w = jax.random.uniform(kw, (fan_in, fan_out), jnp.float32, -bound, bound)
        b = jax.random.uniform(kb, (1, fan_out), jnp.float32, -bound, bound)
        return w.astype(weight_dtype), b

    w1, b1 = lin(ks[0], ks[1], state_dim, hidden)
    w2, b2 = lin(ks[2], ks[3], hidden, hidden)
    w3, b3 = lin(ks[4], ks[5], hidden, action_dim)
    return {"w1": w1, "b1": b1, "w2": w2, "b2": b2, "w3": w3, "b3": b3}


def actor_reference(state, params, max_action):
    """Pure-JAX reference with the same numerics (bf16 MXU operands, f32 accum)."""
    bf16, f32 = jnp.bfloat16, jnp.float32

    def lin(x, w, b):
        y = jnp.dot(x.astype(bf16), w.astype(bf16),
                    preferred_element_type=jnp.float32)
        return y + b.astype(f32)

    a = jnp.maximum(lin(state, params["w1"], params["b1"]), 0.0)
    a = jnp.maximum(lin(a, params["w2"], params["b2"]), 0.0)
    return max_action * jnp.tanh(lin(a, params["w3"], params["b3"]))


if __name__ == "__main__":
    key = jax.random.PRNGKey(0)
    k_param, k_state = jax.random.split(key)

    B, state_dim, action_dim, max_action = 4, 16, 8, 1.0
    params = init_actor_params(k_param, state_dim, action_dim)
    state = jax.random.normal(k_state, (B, state_dim), jnp.float32)

    # Jit the caller so padding/casting/slicing fuse around the pallas_call.
    fwd = jax.jit(functools.partial(actor_forward, max_action=max_action))

    out = jax.block_until_ready(fwd(state, params))
    ref = actor_reference(state, params, max_action)

    assert out.shape == (B, action_dim)
    assert jnp.allclose(out, ref, atol=1e-3, rtol=1e-3), "mismatch vs reference"

    print("KERNEL_OK")
</pallas_src>

<mosaic_0001>
module attributes {stable_mosaic.version = 11 : i64} {
  func.func @_actor_kernel(%arg0: i32, %arg1: memref<8x128xbf16, #tpu.memory_space<vmem>>, %arg2: memref<128x256xbf16, #tpu.memory_space<vmem>>, %arg3: memref<1x256xf32, #tpu.memory_space<vmem>>, %arg4: memref<256x256xbf16, #tpu.memory_space<vmem>>, %arg5: memref<1x256xf32, #tpu.memory_space<vmem>>, %arg6: memref<256x128xbf16, #tpu.memory_space<vmem>>, %arg7: memref<1x128xf32, #tpu.memory_space<vmem>>, %arg8: memref<8x128xf32, #tpu.memory_space<vmem>>) attributes {dimension_semantics = [#tpu.dimension_semantics<parallel>], iteration_bounds = array<i64: 1>, scalar_prefetch = 0 : i64, scratch_operands = 0 : i64, tpu.core_type = #tpu.core_type<tc>, window_params = [{transform_indices = @transform_0, window_bounds = array<i64: 8, 128>}, {pipeline_mode = #tpu.pipeline_mode<synchronous>, transform_indices = @transform_1, window_bounds = array<i64: 128, 256>}, {pipeline_mode = #tpu.pipeline_mode<synchronous>, transform_indices = @transform_2, window_bounds = array<i64: 1, 256>}, {pipeline_mode = #tpu.pipeline_mode<synchronous>, transform_indices = @transform_3, window_bounds = array<i64: 256, 256>}, {pipeline_mode = #tpu.pipeline_mode<synchronous>, transform_indices = @transform_4, window_bounds = array<i64: 1, 256>}, {pipeline_mode = #tpu.pipeline_mode<synchronous>, transform_indices = @transform_5, window_bounds = array<i64: 256, 128>}, {pipeline_mode = #tpu.pipeline_mode<synchronous>, transform_indices = @transform_6, window_bounds = array<i64: 1, 128>}, {transform_indices = @transform_7, window_bounds = array<i64: 8, 128>}]} {
    %c0 = arith.constant 0 : index
    %c0_0 = arith.constant 0 : index
    %0 = vector.load %arg1[%c0, %c0_0] : memref<8x128xbf16, #tpu.memory_space<vmem>>, vector<8x128xbf16>
    %c0_1 = arith.constant 0 : index
    %c0_2 = arith.constant 0 : index
    %1 = vector.load %arg2[%c0_1, %c0_2] : memref<128x256xbf16, #tpu.memory_space<vmem>>, vector<128x256xbf16>
    %cst = arith.constant dense<0.000000e+00> : vector<8x256xf32>
    %2 = tpu.matmul %0, %1, %cst {dimension_numbers = #tpu.dot_dimension_numbers<[1], [0], [0], [1], [0, 0, 1, 1], [], []>} : vector<8x128xbf16>, vector<128x256xbf16>, vector<8x256xf32> -> vector<8x256xf32>
    %c0_3 = arith.constant 0 : index
    %c0_4 = arith.constant 0 : index
    %3 = vector.load %arg3[%c0_3, %c0_4] : memref<1x256xf32, #tpu.memory_space<vmem>>, vector<1x256xf32>
    %4 = vector.broadcast %3 : vector<1x256xf32> to vector<8x256xf32>
    %5 = arith.addf %2, %4 : vector<8x256xf32>
    %cst_5 = arith.constant 0.000000e+00 : f32
    %6 = vector.broadcast %cst_5 : f32 to vector<8x256xf32>
    %7 = arith.maximumf %5, %6 : vector<8x256xf32>
    %8 = arith.truncf %7 : vector<8x256xf32> to vector<8x256xbf16>
    %c0_6 = arith.constant 0 : index
    %c0_7 = arith.constant 0 : index
    %9 = vector.load %arg4[%c0_6, %c0_7] : memref<256x256xbf16, #tpu.memory_space<vmem>>, vector<256x256xbf16>
    %cst_8 = arith.constant dense<0.000000e+00> : vector<8x256xf32>
    %10 = tpu.matmul %8, %9, %cst_8 {dimension_numbers = #tpu.dot_dimension_numbers<[1], [0], [0], [1], [0, 0, 1, 1], [], []>} : vector<8x256xbf16>, vector<256x256xbf16>, vector<8x256xf32> -> vector<8x256xf32>
    %c0_9 = arith.constant 0 : index
    %c0_10 = arith.constant 0 : index
    %11 = vector.load %arg5[%c0_9, %c0_10] : memref<1x256xf32, #tpu.memory_space<vmem>>, vector<1x256xf32>
    %12 = vector.broadcast %11 : vector<1x256xf32> to vector<8x256xf32>
    %13 = arith.addf %10, %12 : vector<8x256xf32>
    %cst_11 = arith.constant 0.000000e+00 : f32
    %14 = vector.broadcast %cst_11 : f32 to vector<8x256xf32>
    %15 = arith.maximumf %13, %14 : vector<8x256xf32>
    %16 = arith.truncf %15 : vector<8x256xf32> to vector<8x256xbf16>
    %c0_12 = arith.constant 0 : index
    %c0_13 = arith.constant 0 : index
    %17 = vector.load %arg6[%c0_12, %c0_13] : memref<256x128xbf16, #tpu.memory_space<vmem>>, vector<256x128xbf16>
    %cst_14 = arith.constant dense<0.000000e+00> : vector<8x128xf32>
    %18 = tpu.matmul %16, %17, %cst_14 {dimension_numbers = #tpu.dot_dimension_numbers<[1], [0], [0], [1], [0, 0, 1, 1], [], []>} : vector<8x256xbf16>, vector<256x128xbf16>, vector<8x128xf32> -> vector<8x128xf32>
    %c0_15 = arith.constant 0 : index
    %c0_16 = arith.constant 0 : index
    %19 = vector.load %arg7[%c0_15, %c0_16] : memref<1x128xf32, #tpu.memory_space<vmem>>, vector<1x128xf32>
    %20 = vector.broadcast %19 : vector<1x128xf32> to vector<8x128xf32>
    %21 = arith.addf %18, %20 : vector<8x128xf32>
    %22 = math.tanh %21 : vector<8x128xf32>
    %cst_17 = arith.constant 1.000000e+00 : f32
    %23 = vector.broadcast %cst_17 : f32 to vector<8x128xf32>
    %24 = arith.mulf %23, %22 : vector<8x128xf32>
    %c0_18 = arith.constant 0 : index
    %c0_19 = arith.constant 0 : index
    %25 = vector.load %arg8[%c0_18, %c0_19] : memref<8x128xf32, #tpu.memory_space<vmem>>, vector<8x128xf32>
    tpu.vector_store %arg8[%c0_18, %c0_19], %24 {strides = array<i32>} : memref<8x128xf32, #tpu.memory_space<vmem>>, vector<8x128xf32>,
    return
  }
  func.func @transform_0(%arg0: i32) -> (i32, i32) {
    %c0_i32 = arith.constant 0 : i32
    %c0_i32_0 = arith.constant 0 : i32
    return %arg0, %c0_i32 : i32, i32
  }
  func.func @transform_1(%arg0: i32) -> (i32, i32) {
    %c0_i32 = arith.constant 0 : i32
    %c0_i32_0 = arith.constant 0 : i32
    %c0_i32_1 = arith.constant 0 : i32
    return %c0_i32, %c0_i32_0 : i32, i32
  }
  func.func @transform_2(%arg0: i32) -> (i32, i32) {
    %c0_i32 = arith.constant 0 : i32
    %c0_i32_0 = arith.constant 0 : i32
    %c0_i32_1 = arith.constant 0 : i32
    return %c0_i32, %c0_i32_0 : i32, i32
  }
  func.func @transform_3(%arg0: i32) -> (i32, i32) {
    %c0_i32 = arith.constant 0 : i32
    %c0_i32_0 = arith.constant 0 : i32
    %c0_i32_1 = arith.constant 0 : i32
    return %c0_i32, %c0_i32_0 : i32, i32
  }
  func.func @transform_4(%arg0: i32) -> (i32, i32) {
    %c0_i32 = arith.constant 0 : i32
    %c0_i32_0 = arith.constant 0 : i32
    %c0_i32_1 = arith.constant 0 : i32
    return %c0_i32, %c0_i32_0 : i32, i32
  }
  func.func @transform_5(%arg0: i32) -> (i32, i32) {
    %c0_i32 = arith.constant 0 : i32
    %c0_i32_0 = arith.constant 0 : i32
    %c0_i32_1 = arith.constant 0 : i32
    return %c0_i32, %c0_i32_0 : i32, i32
  }
  func.func @transform_6(%arg0: i32) -> (i32, i32) {
    %c0_i32 = arith.constant 0 : i32
    %c0_i32_0 = arith.constant 0 : i32
    %c0_i32_1 = arith.constant 0 : i32
    return %c0_i32, %c0_i32_0 : i32, i32
  }
  func.func @transform_7(%arg0: i32) -> (i32, i32) {
    %c0_i32 = arith.constant 0 : i32
    %c0_i32_0 = arith.constant 0 : i32
    return %arg0, %c0_i32 : i32, i32
  }
}

</mosaic_0001>

<bundles_post_ra>
// kernel: actor_forward.1
= control target key start
LH: loop header
LB: loop body
LE: loop exit
PB: predicated region body
PF: predicated region fallthrough
CT: control target
= control target key end

     0   :  { %v789_v1 = vmov 0   ;;  %v46_v62 = vlaneseq  ;;  %s1037_s1 = inlined_call_operand.vmem [shape: bf16[128,256], index: 1, kind: input, shape index: {}]   ;;  %s1038_s3 = inlined_call_operand.vmem [shape: bf16[256,256], index: 3, kind: input, shape index: {}]   ;;  %s1039_s0 = inlined_call_operand.vmem [shape: bf16[8,128], index: 0, kind: input, shape index: {}]   ;;  %s1040_s5 = inlined_call_operand.vmem [shape: bf16[256,128], index: 5, kind: input, shape index: {}]   ;;  %s1041_s2 = inlined_call_operand.vmem [shape: f32[1,256], index: 2, kind: input, shape index: {}]   ;;  %s1042_s4 = inlined_call_operand.vmem [shape: f32[1,256], index: 4, kind: input, shape index: {}]   ;;  %s1043_s6 = inlined_call_operand.vmem [shape: f32[1,128], index: 6, kind: input, shape index: {}]   ;;  %s1044_s7 = inlined_call_operand.vmem [shape: f32[8,128], index: 7, kind: output, shape index: {}]  }
   0x1   :  { %v699_v0 = vld [vmem:[%s1037_s1 + $0x74] ss:$8 sps:$4 sm:$0xff]   ;;  %168 = vmatprep.mubr.bf16.mxu0 %v789_v1  ;;  %v701_v2 = vld [vmem:[%s1037_s1 + $0x70] ss:$8 sps:$4 sm:$0xff]   ;;  %v702_v3 = vld [vmem:[%s1037_s1 + $0x64] ss:$8 sps:$4 sm:$0xff]  }
   0x2   :  { %136 = vmatprep.subr.bf16.mxu0 %v699_v0  ;;  %v704_v4 = vld [vmem:[%s1037_s1 + $0x60] ss:$8 sps:$4 sm:$0xff]   ;;  %v705_v5 = vld [vmem:[%s1037_s1 + $0x54] ss:$8 sps:$4 sm:$0xff]   ;;  %v707_v6 = vld [vmem:[%s1037_s1 + $0x50] ss:$8 sps:$4 sm:$0xff]  }
   0x3   :  { %137 = vmatpush1.bf16.msra.mxu0 %v701_v2  ;;  %v708_v7 = vld [vmem:[%s1037_s1 + $0x44] ss:$8 sps:$4 sm:$0xff]   ;;  %v710_v8 = vld [vmem:[%s1037_s1 + $0x40] ss:$8 sps:$4 sm:$0xff]   ;;  %v711_v9 = vld [vmem:[%s1037_s1 + $0x34] ss:$8 sps:$4 sm:$0xff]  }
   0x4   :  { %138 = vmatprep.subr.bf16.mxu0 %v702_v3  ;;  %v723_v10 = vld [vmem:[%s1038_s3 + $0x74] ss:$8 sps:$4 sm:$0xff]   ;;  %v725_v11 = vld [vmem:[%s1038_s3 + $0x70] ss:$8 sps:$4 sm:$0xff]   ;;  %v726_v12 = vld [vmem:[%s1038_s3 + $0x64] ss:$8 sps:$4 sm:$0xff]  }
   0x5   :  { %385 = vmatprep.subr.bf16.mxu1 %v723_v10  ;;  %v713_v13 = vld [vmem:[%s1037_s1 + $0x30] ss:$8 sps:$4 sm:$0xff]   ;;  %v728_v14 = vld [vmem:[%s1038_s3 + $0x60] ss:$8 sps:$4 sm:$0xff]   ;;  %v729_v15 = vld [vmem:[%s1038_s3 + $0x54] ss:$8 sps:$4 sm:$0xff]  }
   0x6   :  { %386 = vmatpush1.bf16.msra.mxu1 %v725_v11  ;;  %v714_v16 = vld [vmem:[%s1037_s1 + $0x24] ss:$8 sps:$4 sm:$0xff]   ;;  %v716_v17 = vld [vmem:[%s1037_s1 + $0x20] ss:$8 sps:$4 sm:$0xff]   ;;  %v731_v18 = vld [vmem:[%s1038_s3 + $0x50] ss:$8 sps:$4 sm:$0xff]  }
   0x7   :  { %139 = vmatpush1.bf16.msra.mxu0 %v704_v4  ;;  %387 = vmatprep.subr.bf16.mxu1 %v726_v12  ;;  %v732_v19 = vld [vmem:[%s1038_s3 + $0x44] ss:$8 sps:$4 sm:$0xff]   ;;  %v717_v20 = vld [vmem:[%s1037_s1 + $0x14] ss:$8 sps:$4 sm:$0xff]   ;;  %v719_v21 = vld [vmem:[%s1037_s1 + $0x10] ss:$8 sps:$4 sm:$0xff]  }
   0x8   :  { %140 = vmatprep.subr.bf16.mxu0 %v705_v5  ;;  %v734_v22 = vld [vmem:[%s1038_s3 + $0x40] ss:$8 sps:$4 sm:$0xff]   ;;  %v735_v23 = vld [vmem:[%s1038_s3 + $0x34] ss:$8 sps:$4 sm:$0xff]   ;;  %v720_v24 = vld [vmem:[%s1037_s1 + $0x4] ss:$8 sps:$4 sm:$0xff]  }
   0x9   :  { %v722_v25 = vld [vmem:[%s1037_s1] ss:$8 sps:$4 sm:$0xff]   ;;  %v737_v26 = vld [vmem:[%s1038_s3 + $0x30] ss:$8 sps:$4 sm:$0xff]   ;;  %v738_v27 = vld [vmem:[%s1038_s3 + $0x24] ss:$8 sps:$4 sm:$0xff]  }
   0xa   :  { %388 = vmatpush1.bf16.msra.mxu1 %v728_v14  ;;  %v740_v28 = vld [vmem:[%s1038_s3 + $0x20] ss:$8 sps:$4 sm:$0xff]   ;;  %v741_v30 = vld [vmem:[%s1038_s3 + $0x14] ss:$8 sps:$4 sm:$0xff]   ;;  %v743_v31 = vld [vmem:[%s1038_s3 + $0x10] ss:$8 sps:$4 sm:$0xff]  }
   0xb   :  { %141 = vmatpush1.bf16.msra.mxu0 %v707_v6  ;;  %389 = vmatprep.subr.bf16.mxu1 %v729_v15  ;;  %v27_v29 = vld [vmem:[%s1039_s0] sm:$0xf]  ;;  %v744_v32 = vld [vmem:[%s1038_s3 + $0x4] ss:$8 sps:$4 sm:$0xff]   ;;  %v747_v34 = vld [vmem:[%s1038_s3 + $0xf4] ss:$8 sps:$4 sm:$0xff]  }
   0xc   :  { %142 = vmatprep.subr.bf16.mxu0 %v708_v7  ;;  %v746_v33 = vld [vmem:[%s1038_s3] ss:$8 sps:$4 sm:$0xff]   ;;  %v749_v35 = vld [vmem:[%s1038_s3 + $0xf0] ss:$8 sps:$4 sm:$0xff]   ;;  %v750_v36 = vld [vmem:[%s1038_s3 + $0xe4] ss:$8 sps:$4 sm:$0xff]  }
   0xd   :  { %v752_v37 = vld [vmem:[%s1038_s3 + $0xe0] ss:$8 sps:$4 sm:$0xff]   ;;  %v753_v38 = vld [vmem:[%s1038_s3 + $0xd4] ss:$8 sps:$4 sm:$0xff]   ;;  %v755_v39 = vld [vmem:[%s1038_s3 + $0xd0] ss:$8 sps:$4 sm:$0xff]  }
   0xe   :  { %390 = vmatpush1.bf16.msra.mxu1 %v731_v18  ;;  %v756_v40 = vld [vmem:[%s1038_s3 + $0xc4] ss:$8 sps:$4 sm:$0xff]   ;;  %v758_v41 = vld [vmem:[%s1038_s3 + $0xc0] ss:$8 sps:$4 sm:$0xff]   ;;  %v759_v42 = vld [vmem:[%s1038_s3 + $0xb4] ss:$8 sps:$4 sm:$0xff]  }
   0xf   :  { %143 = vmatpush1.bf16.msra.mxu0 %v710_v8  ;;  %391 = vmatprep.subr.bf16.mxu1 %v732_v19  ;;  %v761_v43 = vld [vmem:[%s1038_s3 + $0xb0] ss:$8 sps:$4 sm:$0xff]   ;;  %v762_v44 = vld [vmem:[%s1038_s3 + $0xa4] ss:$8 sps:$4 sm:$0xff]   ;;  %v764_v45 = vld [vmem:[%s1038_s3 + $0xa0] ss:$8 sps:$4 sm:$0xff]  }
  0x10   :  { %144 = vmatprep.subr.bf16.mxu0 %v711_v9  ;;  %v765_v46 = vld [vmem:[%s1038_s3 + $0x94] ss:$8 sps:$4 sm:$0xff]   ;;  %v767_v47 = vld [vmem:[%s1038_s3 + $0x90] ss:$8 sps:$4 sm:$0xff]   ;;  %v768_v48 = vld [vmem:[%s1038_s3 + $0x84] ss:$8 sps:$4 sm:$0xff]  }
  0x11   :  { %v770_v49 = vld [vmem:[%s1038_s3 + $0x80] ss:$8 sps:$4 sm:$0xff]   ;;  %v771_v50 = vld [vmem:[%s1040_s5 + $0x78] sm:$0xff]   ;;  %v773_v52 = vld [vmem:[%s1040_s5 + $0x70] sm:$0xff]   ;;  %v47_v63 = vshrl.u32 %v46_v62, 7 }
  0x12   :  { %392 = vmatpush1.bf16.msra.mxu1 %v734_v22  ;;  %v772_v51 = vld [vmem:[%s1040_s5 + $0x38] sm:$0xff]   ;;  %v774_v53 = vld [vmem:[%s1040_s5 + $0x30] sm:$0xff]   ;;  %v775_v54 = vld [vmem:[%s1040_s5 + $0x68] sm:$0xff]  }
  0x13   :  { %145 = vmatpush1.bf16.msra.mxu0 %v713_v13  ;;  %393 = vmatprep.subr.bf16.mxu1 %v735_v23  ;;  %v776_v55 = vld [vmem:[%s1040_s5 + $0x28] sm:$0xff]   ;;  %v777_v56 = vld [vmem:[%s1040_s5 + $0x60] sm:$0xff]   ;;  %v779_v58 = vld [vmem:[%s1040_s5 + $0x58] sm:$0xff]   ;;  %v48_v0 = vsub.s32 0, %v47_v63  ;;  %v52_v2 = vsub.s32 1, %v47_v63 }
  0x14   :  { %146 = vmatprep.subr.bf16.mxu0 %v714_v16  ;;  %v778_v57 = vld [vmem:[%s1040_s5 + $0x20] sm:$0xff]   ;;  %v780_v59 = vld [vmem:[%s1040_s5 + $0x18] sm:$0xff]   ;;  %v781_v60 = vld [vmem:[%s1040_s5 + $0x50] sm:$0xff]  }
  0x15   :  { %v782_v61 = vld [vmem:[%s1040_s5 + $0x10] sm:$0xff]   ;;  %v44_v1 = vld [vmem:[%s1041_s2] sm:$0x3]  ;;  %v783_v15 = vld [vmem:[%s1040_s5 + $0x48] sm:$0xff]  }
  0x16   :  { %394 = vmatpush1.bf16.msra.mxu1 %v737_v26  ;;  %v49_v3 = vrot.slane %v44_v1, %v48_v0  ;;  %v53_v4 = vrot.slane %v44_v1, %v52_v2  ;;  %v784_v16 = vld [vmem:[%s1040_s5 + $0x8] sm:$0xff]   ;;  %v786_v18 = vld [vmem:[%s1040_s5] sm:$0xff]  }
  0x17   :  { %147 = vmatpush1.bf16.msra.mxu0 %v716_v17  ;;  %395 = vmatprep.subr.bf16.mxu1 %v738_v27  ;;  %v785_v17 = vld [vmem:[%s1040_s5 + $0x40] sm:$0xff]  }
  0x18   :  { %148 = vmatprep.subr.bf16.mxu0 %v717_v20  ;;  %v213_v19 = vld [vmem:[%s1042_s4] sm:$0x3] }
  0x19   :  { %v218_v20 = vrot.slane %v213_v19, %v48_v0 }
  0x1a   :  { %396 = vmatpush1.bf16.msra.mxu1 %v740_v28 }
  0x1b   :  { %149 = vmatpush1.bf16.msra.mxu0 %v719_v21  ;;  %397 = vmatprep.subr.bf16.mxu1 %v741_v30  ;;  %v222_v21 = vrot.slane %v213_v19, %v52_v2 }
  0x1c   :  { %150 = vmatprep.subr.bf16.mxu0 %v720_v24 }
  0x1e   :  { %398 = vmatpush1.bf16.msra.mxu1 %v743_v31 }
  0x1f   :  { %151 = vmatpush1.bf16.msra.mxu0 %v722_v25  ;;  %399 = vmatprep.subr.bf16.mxu1 %v744_v32 }
  0x20   :  { %676 = vmatprep.subr.bf16.mxu0 %v771_v50 }
  0x22   :  { %169 = vmatmul.mubr.bf16.vlgmr.msra.gmra.mxu0 %v27_v29  ;;  %400 = vmatpush1.bf16.msra.mxu1 %v746_v33  ;;  %v659_v33 = vld [vmem:[%s1043_s6] ss:$0 sm:$0xff] }
  0x23   :  { %401 = vmatprep.subr.bf16.mxu1 %v747_v34  ;;  %677 = vmatpush3.bf16.msra.mxu0 %v772_v51 }
  0x24   :  { %678 = vmatprep.subr.bf16.mxu0 %v773_v52 }
  0x26   :  { %402 = vmatpush2.bf16.msra.mxu1 %v749_v35 }
  0x27   :  { %403 = vmatprep.subr.bf16.mxu1 %v750_v36  ;;  %679 = vmatpush3.bf16.msra.mxu0 %v774_v53 }
  0x28   :  { %680 = vmatprep.subr.bf16.mxu0 %v775_v54 }
  0x2a   :  { %404 = vmatpush2.bf16.msra.mxu1 %v752_v37 }
  0x2b   :  { %405 = vmatprep.subr.bf16.mxu1 %v753_v38  ;;  %681 = vmatpush3.bf16.msra.mxu0 %v776_v55 }
  0x2c   :  { %682 = vmatprep.subr.bf16.mxu0 %v777_v56 }
  0x2e   :  { %406 = vmatpush2.bf16.msra.mxu1 %v755_v39 }
  0x2f   :  { %407 = vmatprep.subr.bf16.mxu1 %v756_v40  ;;  %683 = vmatpush3.bf16.msra.mxu0 %v778_v57 }
  0x30   :  { %684 = vmatprep.subr.bf16.mxu0 %v779_v58 }
  0x32   :  { %408 = vmatpush2.bf16.msra.mxu1 %v758_v41 }
  0x33   :  { %409 = vmatprep.subr.bf16.mxu1 %v759_v42  ;;  %685 = vmatpush3.bf16.msra.mxu0 %v780_v59 }
  0x34   :  { %686 = vmatprep.subr.bf16.mxu0 %v781_v60 }
  0x36   :  { %410 = vmatpush2.bf16.msra.mxu1 %v761_v43 }
  0x37   :  { %411 = vmatprep.subr.bf16.mxu1 %v762_v44  ;;  %687 = vmatpush3.bf16.msra.mxu0 %v782_v61 }
  0x38   :  { %688 = vmatprep.subr.bf16.mxu0 %v783_v15 }
  0x3a   :  { %412 = vmatpush2.bf16.msra.mxu1 %v764_v45 }
  0x3b   :  { %413 = vmatprep.subr.bf16.mxu1 %v765_v46  ;;  %689 = vmatpush3.bf16.msra.mxu0 %v784_v16 }
  0x3c   :  { %690 = vmatprep.subr.bf16.mxu0 %v785_v17 }
  0x3e   :  { %414 = vmatpush2.bf16.msra.mxu1 %v767_v47 }
  0x3f   :  { %415 = vmatprep.subr.bf16.mxu1 %v768_v48  ;;  %691 = vmatpush3.bf16.msra.mxu0 %v786_v18 }
  0x42   :  { %416 = vmatpush2.bf16.msra.mxu1 %v770_v49 }
  0xe2   :  { %v170_v5 = vpop.f32.mrf.mxu0 }
  0xe3   :  { %v171_v6 = vadd.f32 %v170_v5, %v49_v3 }
  0xe4   :  { %v172_v7 = vpop.f32.mrf.mxu0 }
  0xe5   :  { %v173_v8 = vadd.f32 %v172_v7, %v53_v4  ;;  %v177_v9 = vmax.f32 %v171_v6, 0.0 }
  0xe6   :  { %v174_v10 = vpop.f32.mrf.mxu0 }
  0xe7   :  { %v178_v11 = vmax.f32 %v173_v8, 0.0  ;;  %v179_v14 = vpack.c.bf16 %v177_v9, %v177_v9 }
  0xe8   :  { %v175_v12 = vpop.f32.mrf.mxu0 }
  0xe9   :  { %v180_v13 = vpack.c.bf16 %v178_v11, %v178_v11 }
  0xeb   :  { %417 = vmatprep.mubr.bf16.mxu1 %v180_v13 }
  0xec   :  { %418 = vmatmul.mubr.bf16.vlgmr.msra.gmra.mxu1 %v179_v14 }
 0x1ac   :  { %v419_v22 = vpop.f32.mrf.mxu1 }
 0x1ad   :  { %v420_v23 = vadd.f32 %v419_v22, %v218_v20 }
 0x1ae   :  { %v421_v24 = vpop.f32.mrf.mxu1 }
 0x1af   :  { %v422_v25 = vadd.f32 %v421_v24, %v222_v21  ;;  %v426_v26 = vmax.f32 %v420_v23, 0.0 }
 0x1b0   :  { %v423_v27 = vpop.f32.mrf.mxu1 }
 0x1b1   :  { %v427_v28 = vmax.f32 %v422_v25, 0.0  ;;  %v428_v31 = vpack.c.bf16 %v426_v26, %v426_v26 }
 0x1b2   :  { %v424_v29 = vpop.f32.mrf.mxu1 }
 0x1b3   :  { %v429_v30 = vpack.c.bf16 %v427_v28, %v427_v28 }
 0x1b5   :  { %597 = vmatprep.mubr.bf16.mxu0 %v429_v30 }
 0x1b6   :  { %598 = vmatmul.mubr.bf16.vlgmr.msra.gmra.mxu0 %v428_v31 }
 0x276   :  { %v692_v32 = vpop.f32.mrf.mxu0 }
 0x278   :  { %v693_v34 = vpop.f32.mrf.mxu0 }
 0x279   :  { %v694_v35 = vadd.f32 %v693_v34, %v692_v32 }
 0x27a   :  { %v695_v36 = vpop.f32.mrf.mxu0 }
 0x27b   :  { %v600_v37 = vadd.f32 %v694_v35, %v659_v33 }
 0x27c   :  { %v696_v38 = vpop.f32.mrf.mxu0 }
 0x27d   :  { %787 = vtanh.f32 %v600_v37 }
 0x28a   :  { %v788_v39 = vpop.eup %787 }
 0x28b   :  { %606 = vst [vmem:[%s1044_s7] sm:$0xff] %v788_v39 }

</bundles_post_ra>
